<compile_context>
chip_gen: v6e
topology: v6e:2x2x1
jax: 0.10.0
libtpu: 0.0.40
codegen_flags: <defaults>
</compile_context>

<pallas_src>
import functools

import jax
import jax.numpy as jnp
from jax.experimental import pallas as pl
from jax.experimental.pallas import tpu as pltpu


# ----------------------------------------------------------------------------
# VMEM-aware sizing
# ----------------------------------------------------------------------------
def _vmem_limit_bytes():
    """Scoped-VMEM request sized from physical capacity (v5e/v6e: 128 MiB,
    v7x: 64 MiB), leaving headroom for Mosaic-internal scratch."""
    try:
        cap = int(pltpu.get_tpu_info().vmem_capacity_bytes)
    except Exception:  # interpret mode / older runtimes
        cap = 64 * 1024 * 1024
    return max(32 * 1024 * 1024, min(cap * 3 // 4, 96 * 1024 * 1024))


_VMEM_LIMIT = _vmem_limit_bytes()


def _pick_l_tile(L, C, D, out_itemsize, vmem_budget, max_l_tile=None):
    """Largest lane tile (multiple of 128, capped at 2048) whose
    double-buffered input+output tiles fit the VMEM budget.  L need not be
    divisible: the tail tile is masked inside the kernel."""
    per_col = 2 * C * 4 + 2 * D * out_itemsize + 16   # dbl-buffered x & y per lane column
    fixed = 2 * (D * C + 2 * D) * 4                   # weights + bias + partial sums
    tl = max((vmem_budget - fixed) // per_col, 128)
    tl = min(int(tl), 2048)
    if max_l_tile is not None:
        tl = min(tl, int(max_l_tile))
    if tl >= L:
        return L                                       # single full-extent tile
    return max(128, (tl // 128) * 128)                 # lane-aligned tile


# ----------------------------------------------------------------------------
# Kernels
# ----------------------------------------------------------------------------
def _backbone_pool_kernel(x_ref, wt_ref, b_ref, *out_refs, l_total, l_tile):
    """Fused channels-first 1x1x1-conv (matmul) + ReLU (+ optional activation
    store) + partial sum over the L (lane) axis.

    Grid (N, cdiv(L, TL)); both axes "parallel" (no cross-step carry).
      x_ref  : (C, TL)    NCTHW input tile (no transpose anywhere)
      wt_ref : (D, C)     transposed conv weight
      b_ref  : (D, 1)     bias
      out_refs = (feats_ref (D, TL), psum_ref (1, D, 1))  if materializing
               = (psum_ref (1, D, 1),)                    otherwise
    """
    psum_ref = out_refs[-1]
    y = jnp.dot(wt_ref[...], x_ref[...], preferred_element_type=jnp.float32)
    y = jnp.maximum(y + b_ref[...], 0.0)

    if len(out_refs) == 2:                    # lane-dense (D, TL) store
        out_refs[0][...] = y.astype(out_refs[0].dtype)

    if l_total % l_tile != 0:
        # Mask padded tail columns out of the pooled sum (OOB stores of the
        # activation tile above are dropped by Pallas automatically).
        valid = l_total - pl.program_id(1) * l_tile
        lane = jax.lax.broadcasted_iota(jnp.int32, y.shape, 1)
        y = jnp.where(lane < valid, y, 0.0)

    psum_ref[...] = jnp.sum(y, axis=1, keepdims=True)[None].astype(psum_ref.dtype)


def _heads_kernel(x_ref, xw_ref, xb_ref, pw2_ref, pb2_ref, hw_ref, hb_ref,
                  proj_ref, futpast_ref, futlog_ref, *, d):
    """All small heads fused; pooled features pushed through the MXU ONCE
    against the pre-concatenated slab [proj_w1 | fut_w | cls_verb|cls_noun|reg].

      proj_ref    = relu(x@proj_w1 + b1) @ proj_w2 + b2      (project_mlp)
      futpast_ref = [ x@fut_w + fb  |  x@heads_w + hb ]      (future feats | past logits)
      futlog_ref  = fut @ heads_w + hb                       (future logits + regression)
    """
    x = x_ref[...]
    s = jnp.dot(x, xw_ref[...], preferred_element_type=jnp.float32) + xb_ref[...]
    h = jnp.maximum(s[:, :d], 0.0)
    fut = s[:, d:2 * d]
    futpast_ref[...] = s[:, d:].astype(futpast_ref.dtype)
    proj_ref[...] = (jnp.dot(h, pw2_ref[...], preferred_element_type=jnp.float32)
                     + pb2_ref[...]).astype(proj_ref.dtype)
    futlog_ref[...] = (jnp.dot(fut, hw_ref[...], preferred_element_type=jnp.float32)
                       + hb_ref[...]).astype(futlog_ref.dtype)


# ----------------------------------------------------------------------------
# Wrappers
# ----------------------------------------------------------------------------
def pallas_backbone_pool(x_cf, w_t, b, *, feats_dtype=jnp.float32,
                         materialize_backbone=True, max_l_tile=None):
    """x_cf: (N, C, L) channels-first slab (free reshape of NCTHW).

    Returns:
      feats_cf : (N, D, L) ReLU(conv1x1x1) output in NCTHW-compatible layout
                 (None when materialize_backbone=False).
      pooled   : (N, D)    uniform mean over L (== mean over H,W then T).
    """
    N, C, L = x_cf.shape
    D = w_t.shape[0]
    itemsize = jnp.dtype(feats_dtype).itemsize if materialize_backbone else 0
    TL = _pick_l_tile(L, C, D, itemsize, int(_VMEM_LIMIT * 0.8), max_l_tile)
    n_l = pl.cdiv(L, TL)

    out_shape = [jax.ShapeDtypeStruct((N, n_l, D, 1), jnp.float32)]
    out_specs = [pl.BlockSpec((None, 1, D, 1), lambda n, l: (n, l, 0, 0))]
    if materialize_backbone:
        out_shape.insert(0, jax.ShapeDtypeStruct((N, D, L), feats_dtype))
        out_specs.insert(0, pl.BlockSpec((None, D, TL), lambda n, l: (n, 0, l)))

    kernel = functools.partial(_backbone_pool_kernel, l_total=L, l_tile=TL)
    res = pl.pallas_call(
        kernel,
        out_shape=tuple(out_shape),
        grid=(N, n_l),
        in_specs=[
            pl.BlockSpec((None, C, TL), lambda n, l: (n, 0, l)),
            pl.BlockSpec((D, C), lambda n, l: (0, 0)),
            pl.BlockSpec((D, 1), lambda n, l: (0, 0)),
        ],
        out_specs=tuple(out_specs),
        compiler_params=pltpu.CompilerParams(
            dimension_semantics=("parallel", "parallel"),
            vmem_limit_bytes=_VMEM_LIMIT),
    )(x_cf, w_t, b.reshape(D, 1))

    if materialize_backbone:
        feats_cf, psum = res
    else:
        (psum,) = res
        feats_cf = None
    pooled = psum[:, :, :, 0].sum(axis=1) * (1.0 / L)        # (N, D), tiny reduce
    return feats_cf, pooled


def pallas_heads(feats, params, num_classes):
    """Single fused pallas_call for project_mlp / future predictor /
    classifiers / regression head on (N, D) pooled features."""
    N, D = feats.shape
    P = params["proj_w2"].shape[1]
    Hn = params["heads_w"].shape[1]
    Sw = params["xslab_w"].shape[1]          # = 2*D + Hn

    TM = min(N, 512)
    grid = (pl.cdiv(N, TM),)
    kernel = functools.partial(_heads_kernel, d=D)

    proj, futpast, futlog = pl.pallas_call(
        kernel,
        out_shape=(jax.ShapeDtypeStruct((N, P), jnp.float32),
                   jax.ShapeDtypeStruct((N, D + Hn), jnp.float32),
                   jax.ShapeDtypeStruct((N, Hn), jnp.float32)),
        grid=grid,
        in_specs=[
            pl.BlockSpec((TM, D), lambda i: (i, 0)),   # pooled features
            pl.BlockSpec((D, Sw), lambda i: (0, 0)),   # [proj_w1 | fut_w | heads_w]
            pl.BlockSpec((1, Sw), lambda i: (0, 0)),   # fused biases
            pl.BlockSpec((D, P), lambda i: (0, 0)),    # proj_w2
            pl.BlockSpec((1, P), lambda i: (0, 0)),    # proj_b2
            pl.BlockSpec((D, Hn), lambda i: (0, 0)),   # cls+reg weights
            pl.BlockSpec((1, Hn), lambda i: (0, 0)),   # cls+reg biases
        ],
        out_specs=(
            pl.BlockSpec((TM, P), lambda i: (i, 0)),
            pl.BlockSpec((TM, D + Hn), lambda i: (i, 0)),
            pl.BlockSpec((TM, Hn), lambda i: (i, 0)),
        ),
        compiler_params=pltpu.CompilerParams(
            dimension_semantics=("arbitrary",),
            vmem_limit_bytes=_VMEM_LIMIT),
    )(feats,
      params["xslab_w"], params["xslab_b"].reshape(1, Sw),
      params["proj_w2"], params["proj_b2"].reshape(1, P),
      params["heads_w"], params["heads_b"].reshape(1, Hn))

    out = {"proj": proj, "future": futpast[:, :D]}
    past_slab = futpast[:, D:]
    off = 0
    for k, n_cls in num_classes.items():
        out[f"past_logits/{k}"] = past_slab[:, off:off + n_cls]
        out[f"logits/{k}"] = futlog[:, off:off + n_cls]
        off += n_cls
    out["logits_regression"] = futlog[:, off:off + 1]
    return out


# ----------------------------------------------------------------------------
# Model forward
# ----------------------------------------------------------------------------
def forward_singlecrop(params, video, num_classes, *, feats_dtype=jnp.float32,
                       materialize_backbone=True, max_l_tile=None):
    """video: (B, num_clips, C, T, H, W)."""
    outputs, aux_losses = {}, {}
    B, num_clips, C, T, H, W = video.shape
    N = B * num_clips
    L = T * H * W

    # Channels-first slab: a pure metadata reshape of the NCTHW input —
    # no HBM transpose pass on either side of the kernel.
    x_cf = video.reshape(N, C, L)

    feats_cf, feats_mean = pallas_backbone_pool(
        x_cf, params["backbone_wt"], params["backbone_b"],
        feats_dtype=feats_dtype, materialize_backbone=materialize_backbone,
        max_l_tile=max_l_tile)

    if materialize_backbone:
        # 'backbone' is already in PyTorch NCTHW layout — free reshape.
        outputs["backbone"] = feats_cf.reshape(N, -1, T, H, W)

    outputs["backbone_mean"] = feats_mean
    # temporal_aggregator (mean over T of the HW-mean) == same uniform mean;
    # reset_temp_agg_feat_dim / mapper_to_inter are identity here.
    feats_agg = feats_mean
    outputs["temp_agg"] = feats_agg

    # num_clips == 1 handled naturally; future predictor passes past through.
    heads = pallas_heads(feats_agg, params, num_classes)

    # project_mlp is applied to identical features in all three places.
    outputs["backbone_mean_projected"] = heads["proj"]
    outputs["temp_agg_projected"] = heads["proj"]
    outputs["future_projected"] = heads["proj"]

    outputs["future"] = heads["future"]
    outputs["past"] = feats_agg

    # classifier_on_past = True; dropout identity in eval.
    for k in num_classes:
        outputs[f"past_logits/{k}"] = heads[f"past_logits/{k}"]

    # temporal_aggregator_after_future_pred: identity
    outputs["future_agg"] = heads["future"]
    for k in num_classes:
        outputs[f"logits/{k}"] = heads[f"logits/{k}"]
    outputs["logits_regression"] = heads["logits_regression"]

    # TODO(synk): aux losses / endpoints of the hydra temporal aggregator and
    # future predictor are config-dependent and not reproducible; left empty.
    return outputs, aux_losses


def model_forward(params, video, num_classes, **fwd_kwargs):
    """video: (B, #clips, C, T, H, W) or (B, #clips, #crops, C, T, H, W)."""
    if video.ndim == 6:
        crops = [video]
    elif video.ndim == 7 and video.shape[2] == 1:
        crops = [jnp.squeeze(video, 2)]
    elif video.ndim == 7:
        crops = [video[:, :, i] for i in range(video.shape[2])]
    else:
        raise NotImplementedError(f"Unsupported size {video.shape}")

    feats_losses = [forward_singlecrop(params, c, num_classes, **fwd_kwargs)
                    for c in crops]
    feats_list = [fl[0] for fl in feats_losses]
    losses_list = [fl[1] for fl in feats_losses]
    feats = {k: jnp.mean(jnp.stack([d[k] for d in feats_list], 0), 0)
             for k in feats_list[0]}
    losses = {k: jnp.mean(jnp.stack([d[k] for d in losses_list], 0), 0)
              for k in losses_list[0]}
    return feats, losses


# ----------------------------------------------------------------------------
# Deterministic parameter init (mirrors _initialize_weights: normal(0, 0.01)
# for Linear weights, kaiming-ish normal for the conv, zero biases).
# Fused weight slabs are precomputed ONCE here (not per forward call).
# ----------------------------------------------------------------------------
def init_params(key, C, D, P, num_classes):
    ks = jax.random.split(key, 8)
    params = {
        "backbone_w": jax.random.normal(ks[0], (C, D), jnp.float32) * (2.0 / D) ** 0.5,
        "backbone_b": jnp.zeros((D,), jnp.float32),
        "fut_w": jax.random.normal(ks[1], (D, D), jnp.float32) * 0.01,
        "fut_b": jnp.zeros((D,), jnp.float32),
        "proj_w1": jax.random.normal(ks[2], (D, D), jnp.float32) * 0.01,
        "proj_b1": jnp.zeros((D,), jnp.float32),
        "proj_w2": jax.random.normal(ks[3], (D, P), jnp.float32) * 0.01,
        "proj_b2": jnp.zeros((P,), jnp.float32),
        "reg_w": jax.random.normal(ks[4], (D, 1), jnp.float32) * 0.01,
        "reg_b": jnp.zeros((1,), jnp.float32),
    }
    for i, (name, n_cls) in enumerate(num_classes.items()):
        params[f"cls_{name}_w"] = (
            jax.random.normal(ks[5 + i], (D, n_cls), jnp.float32) * 0.01)
        params[f"cls_{name}_b"] = jnp.zeros((n_cls,), jnp.float32)

    # Precomputed fused slabs used by the kernels.
    params["backbone_wt"] = params["backbone_w"].T                       # (D, C)
    params["heads_w"] = jnp.concatenate(
        [params[f"cls_{k}_w"] for k in num_classes] + [params["reg_w"]], axis=1)
    params["heads_b"] = jnp.concatenate(
        [params[f"cls_{k}_b"] for k in num_classes] + [params["reg_b"]], axis=0)
    params["xslab_w"] = jnp.concatenate(
        [params["proj_w1"], params["fut_w"], params["heads_w"]], axis=1)  # (D, 2D+Hn)
    params["xslab_b"] = jnp.concatenate(
        [params["proj_b1"], params["fut_b"], params["heads_b"]], axis=0)
    return params


if __name__ == "__main__":
    # L = T*H*W = 400 is deliberately NOT a multiple of 128 to exercise the
    # masked-tail partial-tile path (with max_l_tile=128 forcing tiling).
    B, CLIPS, C, T, H, W = 2, 1, 4, 4, 10, 10
    D, P = 32, 16
    num_classes = {"verb": 10, "noun": 12}

    key = jax.random.PRNGKey(0)
    k_vid, k_par = jax.random.split(key)
    video = jax.random.normal(k_vid, (B, CLIPS, C, T, H, W), jnp.float32)
    params = init_params(k_par, C, D, P, num_classes)

    # Run 1: tiled L axis (TL=128, 4 blocks, masked 16-wide tail), full outputs.
    feats, losses = model_forward(params, video, num_classes, max_l_tile=128)
    jax.block_until_ready(feats["logits/verb"])
    jax.block_until_ready(feats["future_agg"])

    # Run 2: auto (single full-L tile) + skip materializing the big activation.
    feats2, _ = model_forward(params, video, num_classes,
                              materialize_backbone=False)
    jax.block_until_ready(feats2["backbone_mean"])

    # shape sanity checks
    N = B * CLIPS
    L = T * H * W
    assert feats["backbone"].shape == (N, D, T, H, W)
    assert feats["backbone_mean"].shape == (N, D)
    assert feats["logits/verb"].shape == (N, 10)
    assert feats["logits/noun"].shape == (N, 12)
    assert feats["past_logits/verb"].shape == (N, 10)
    assert feats["logits_regression"].shape == (N, 1)
    assert feats["temp_agg_projected"].shape == (N, P)
    assert feats["future"].shape == (N, D)

    # numerical sanity checks against a plain-JAX reference
    vid = video.reshape(N, C, T, H, W)
    x_cl = jnp.transpose(vid, (0, 2, 3, 4, 1)).reshape(N, L, C)
    feats_ref = jnp.maximum(
        x_cl @ params["backbone_w"] + params["backbone_b"], 0.0)       # (N,L,D)
    mean_ref = feats_ref.mean(axis=1)                                   # (N,D)
    bb_ref = jnp.transpose(feats_ref.reshape(N, T, H, W, D), (0, 4, 1, 2, 3))
    fut_ref = mean_ref @ params["fut_w"] + params["fut_b"]
    proj_ref = (jnp.maximum(mean_ref @ params["proj_w1"] + params["proj_b1"], 0.0)
                @ params["proj_w2"] + params["proj_b2"])
    logit_verb_ref = fut_ref @ params["cls_verb_w"] + params["cls_verb_b"]
    past_noun_ref = mean_ref @ params["cls_noun_w"] + params["cls_noun_b"]
    reg_ref = fut_ref @ params["reg_w"] + params["reg_b"]

    assert jnp.allclose(feats["backbone"], bb_ref, atol=1e-4, rtol=1e-4)
    assert jnp.allclose(feats["backbone_mean"], mean_ref, atol=1e-4, rtol=1e-4)
    assert jnp.allclose(feats2["backbone_mean"], mean_ref, atol=1e-4, rtol=1e-4)
    assert jnp.allclose(feats["future"], fut_ref, atol=1e-4, rtol=1e-4)
    assert jnp.allclose(feats["temp_agg_projected"], proj_ref, atol=1e-4, rtol=1e-4)
    assert jnp.allclose(feats["logits/verb"], logit_verb_ref, atol=1e-4, rtol=1e-4)
    assert jnp.allclose(feats2["logits/verb"], logit_verb_ref, atol=1e-4, rtol=1e-4)
    assert jnp.allclose(feats["past_logits/noun"], past_noun_ref, atol=1e-4, rtol=1e-4)
    assert jnp.allclose(feats["logits_regression"], reg_ref, atol=1e-4, rtol=1e-4)

    print("KERNEL_OK")
</pallas_src>

<mosaic_0001>
module attributes {stable_mosaic.version = 11 : i64} {
  func.func @_backbone_pool_kernel(%arg0: i32, %arg1: i32, %arg2: memref<1x4x128xf32, #tpu.memory_space<vmem>>, %arg3: memref<32x4xf32, #tpu.memory_space<vmem>>, %arg4: memref<32x1xf32, #tpu.memory_space<vmem>>, %arg5: memref<1x32x128xf32, #tpu.memory_space<vmem>>, %arg6: memref<1x1x32x1xf32, #tpu.memory_space<vmem>>) attributes {dimension_semantics = [#tpu.dimension_semantics<parallel>, #tpu.dimension_semantics<parallel>], iteration_bounds = array<i64: 2, 4>, scalar_prefetch = 0 : i64, scratch_operands = 0 : i64, tpu.core_type = #tpu.core_type<tc>, window_params = [{transform_indices = @transform_0, window_bounds = array<i64: 1, 4, 128>}, {pipeline_mode = #tpu.pipeline_mode<synchronous>, transform_indices = @transform_1, window_bounds = array<i64: 32, 4>}, {pipeline_mode = #tpu.pipeline_mode<synchronous>, transform_indices = @transform_2, window_bounds = array<i64: 32, 1>}, {transform_indices = @transform_3, window_bounds = array<i64: 1, 32, 128>}, {transform_indices = @transform_4, window_bounds = array<i64: 1, 1, 32, 1>}]} {
    %c0 = arith.constant 0 : index
    %c0_0 = arith.constant 0 : index
    %0 = vector.load %arg3[%c0, %c0_0] : memref<32x4xf32, #tpu.memory_space<vmem>>, vector<32x4xf32>
    %c0_1 = arith.constant 0 : index
    %c0_2 = arith.constant 0 : index
    %c0_3 = arith.constant 0 : index
    %1 = vector.load %arg2[%c0_1, %c0_2, %c0_3] : memref<1x4x128xf32, #tpu.memory_space<vmem>>, vector<1x4x128xf32>
    %2 = vector.shape_cast %1 : vector<1x4x128xf32> to vector<4x128xf32>
    %cst = arith.constant dense<0.000000e+00> : vector<32x128xf32>
    %3 = tpu.matmul %0, %2, %cst {dimension_numbers = #tpu.dot_dimension_numbers<[1], [0], [0], [1], [0, 0, 1, 1], [], []>} : vector<32x4xf32>, vector<4x128xf32>, vector<32x128xf32> -> vector<32x128xf32>
    %c0_4 = arith.constant 0 : index
    %c0_5 = arith.constant 0 : index
    %4 = vector.load %arg4[%c0_4, %c0_5] : memref<32x1xf32, #tpu.memory_space<vmem>>, vector<32x1xf32>
    %5 = vector.broadcast %4 : vector<32x1xf32> to vector<32x128xf32>
    %6 = arith.addf %3, %5 : vector<32x128xf32>
    %cst_6 = arith.constant 0.000000e+00 : f32
    %7 = vector.broadcast %cst_6 : f32 to vector<32x128xf32>
    %8 = arith.maximumf %6, %7 : vector<32x128xf32>
    %c0_7 = arith.constant 0 : index
    %c0_8 = arith.constant 0 : index
    %c0_9 = arith.constant 0 : index
    %9 = vector.load %arg5[%c0_7, %c0_8, %c0_9] : memref<1x32x128xf32, #tpu.memory_space<vmem>>, vector<1x32x128xf32>
    %10 = vector.shape_cast %9 : vector<1x32x128xf32> to vector<32x128xf32>
    %11 = vector.shape_cast %8 : vector<32x128xf32> to vector<1x32x128xf32>
    tpu.vector_store %arg5[%c0_7, %c0_8, %c0_9], %11 {strides = array<i32>} : memref<1x32x128xf32, #tpu.memory_space<vmem>>, vector<1x32x128xf32>,
    %c128_i32 = arith.constant 128 : i32
    %12 = arith.muli %arg1, %c128_i32 : i32
    %c400_i32 = arith.constant 400 : i32
    %13 = arith.subi %c400_i32, %12 : i32
    %14 = tpu.iota {dimensions = array<i32: 1>} : vector<32x128xi32>
    %15 = vector.broadcast %13 : i32 to vector<32x128xi32>
    %16 = arith.cmpi slt, %14, %15 : vector<32x128xi32>
    %cst_10 = arith.constant 0.000000e+00 : f32
    %17 = vector.broadcast %cst_10 : f32 to vector<32x128xf32>
    %18 = arith.select %16, %8, %17 : vector<32x128xi1>, vector<32x128xf32>
    %cst_11 = arith.constant dense<0.000000e+00> : vector<32xf32>
    %19 = vector.multi_reduction <add>, %18, %cst_11 [1] : vector<32x128xf32> to vector<32xf32>
    %20 = vector.shape_cast %19 : vector<32xf32> to vector<32x1xf32>
    %21 = vector.shape_cast %20 : vector<32x1xf32> to vector<1x32x1xf32>
    %c0_12 = arith.constant 0 : index
    %c0_13 = arith.constant 0 : index
    %c0_14 = arith.constant 0 : index
    %c0_15 = arith.constant 0 : index
    %22 = vector.load %arg6[%c0_12, %c0_13, %c0_14, %c0_15] : memref<1x1x32x1xf32, #tpu.memory_space<vmem>>, vector<1x1x32x1xf32>
    %23 = vector.shape_cast %22 : vector<1x1x32x1xf32> to vector<1x32x1xf32>
    %24 = vector.shape_cast %21 : vector<1x32x1xf32> to vector<1x1x32x1xf32>
    tpu.vector_store %arg6[%c0_12, %c0_13, %c0_14, %c0_15], %24 {strides = array<i32>} : memref<1x1x32x1xf32, #tpu.memory_space<vmem>>, vector<1x1x32x1xf32>,
    return
  }
  func.func @transform_0(%arg0: i32, %arg1: i32) -> (i32, i32, i32) {
    %c0_i32 = arith.constant 0 : i32
    %c0_i32_0 = arith.constant 0 : i32
    return %arg0, %c0_i32, %arg1 : i32, i32, i32
  }
  func.func @transform_1(%arg0: i32, %arg1: i32) -> (i32, i32) {
    %c0_i32 = arith.constant 0 : i32
    %c0_i32_0 = arith.constant 0 : i32
    %c0_i32_1 = arith.constant 0 : i32
    return %c0_i32, %c0_i32_0 : i32, i32
  }
  func.func @transform_2(%arg0: i32, %arg1: i32) -> (i32, i32) {
    %c0_i32 = arith.constant 0 : i32
    %c0_i32_0 = arith.constant 0 : i32
    %c0_i32_1 = arith.constant 0 : i32
    return %c0_i32, %c0_i32_0 : i32, i32
  }
  func.func @transform_3(%arg0: i32, %arg1: i32) -> (i32, i32, i32) {
    %c0_i32 = arith.constant 0 : i32
    %c0_i32_0 = arith.constant 0 : i32
    return %arg0, %c0_i32, %arg1 : i32, i32, i32
  }
  func.func @transform_4(%arg0: i32, %arg1: i32) -> (i32, i32, i32, i32) {
    %c0_i32 = arith.constant 0 : i32
    %c0_i32_0 = arith.constant 0 : i32
    %c0_i32_1 = arith.constant 0 : i32
    return %arg0, %arg1, %c0_i32, %c0_i32_0 : i32, i32, i32, i32
  }
}

</mosaic_0001>

<bundles_post_ra>
// kernel: tpu_custom_call.1
= control target key start
LH: loop header
LB: loop body
LE: loop exit
PB: predicated region body
PF: predicated region fallthrough
CT: control target
= control target key end

     0   :  { %10 = vsyncpa [#allocation3], 0  ;;  %s988_s0 = inlined_call_operand.vmem [shape: f32[2,4,400], index: 0, kind: input, shape index: {}]   ;;  %s989_s1 = inlined_call_operand.vmem [shape: f32[32,4], index: 1, kind: input, shape index: {}]   ;;  %s990_s2 = inlined_call_operand.vmem [shape: f32[32,1], index: 2, kind: input, shape index: {}]   ;;  %s991_s3 = inlined_call_operand.hbm [shape: f32[2,32,400], index: 3, kind: output, shape index: {0}]   ;;  %s992_s4 = inlined_call_operand.vmem [shape: f32[2,4,32,1], index: 4, kind: output, shape index: {1}]  }
   0x1   :  { %12 = vsyncpa [#allocation3 + $0x1], 0  ;;  %s793_s15 = smov 0   ;;  %s795_s16 = smov 0  }
   0x2   :  { %s797_s17 = smov 0   ;;  %s799_s18 = smov 0  }
   0x3   :  { %s801_s19 = smov 0   ;;  %s803_s20 = smov 0  }
   0x4   :  { %s805_s21 = smov 0   ;;  %s807_s22 = smov 0  }
   0x5 LB: > { %s555_s23 = sadd.s32 4294967295, %s761_s22   ;;  %s556_s24 = sadd.s32 4294967294, %s761_s22   ;;  %s761_s22 = sphi %s807_s22, %s18_s22   ;;  %s757_s21 = sphi %s805_s21, %s1006_s21   ;;  %s753_s20 = sphi %s803_s20, %s1005_s20   ;;  %s749_s19 = sphi %s801_s19, %s1004_s19   ;;  %s745_s18 = sphi %s799_s18, %s1003_s18   ;;  %s741_s17 = sphi %s797_s17, %s1002_s17   ;;  %s737_s16 = sphi %s795_s16, %s1001_s16   ;;  %s733_s15 = sphi %s793_s15, %s1000_s15  }
   0x6   : > { %s27_s25 = sadd.s32 1, %s753_s20  ;;  %s30_s26 = sadd.s32 1, %s757_s21 }
   0x7   : > { %p28_p0 = scmp.ge.s32.totalorder %s27_s25, 4  ;;  %p119_p1 = scmp.ne.s32.totalorder %s741_s17, %s737_s16 }
   0x8   : > { %p120_p2 = scmp.eq.s32.totalorder %s555_s23, 7  ;;  %p125_p5 = scmp.ne.s32.totalorder %s737_s16, %s733_s15 }
   0x9   : > { %s1008_s25 = smov (%p28_p0, %s27_s25), 0  ;;  %s1010_s26 = smov (!%p28_p0, %s30_s26), %s757_s21 }
   0xa   : > { %s105_s27 = ssub.s32 %s753_s20, %s1008_s25  ;;  %p844_p3 = por %p120_p2, %p119_p1 }
   0xb   : > { %p32_p4 = scmp.ge.s32.totalorder %s1010_s26, 2  ;;  %p126_p6 = scmp.eq.s32.totalorder %s556_s24, 7 }
   0xc   : > { %p559_p7 = scmp.ge.s32.totalorder %s761_s22, 1  ;;  %p189_p9 = scmp.lt.s32.totalorder %s761_s22, 9 }
   0xd   : > { %s1012_s26 = smov (%p32_p4, %s1010_s26), 0  ;;  %p853_p8 = por %p126_p6, %p125_p5 }
   0xe   : > { %995 = sst [smem:[#allocation5_spill]] %s1012_s26  ;;  %s104_s30 = ssub.s32 %s757_s21, %s1012_s26 }
   0xf   : > { %s109_s5 = sadd.s32 1, %s741_s17  ;;  %s106_s6 = sor.u32 %s105_s27, %s104_s30 }
  0x10   : > { %p190_p10 = pnand %p559_p7, %p189_p9  ;;  %p107_p11 = scmp.eq.s32.totalorder %s106_s6, 0 }
  0x11   : > { %p227_p12 = scmp.lt.s32.totalorder (!%p190_p10), %s749_s19, 1  ;;  %p229_p13 = scmp.lt.s32.totalorder (!%p190_p10), %s745_s18, 3 }
  0x12   : > { %s862_s7 = scalar_select %p107_p11, %s741_s17, %s109_s5  }
  0x13   : > { %193 = sbr.rel (%p190_p10) target bundleno = 381 (0x17d), region = 32  ;;  %s571_s6 = sshll.u32 (!%p190_p10), %s745_s18, 7 }
  0x14   : > { %s213_s26 = sand.u32 (!%p190_p10), 1, %s737_s16   ;;  %s573_s12 = sshll.u32 (!%p190_p10), %s749_s19, 4 }
  0x15   : > { %s560_s9 = sshll.u32 (!%p190_p10), %s213_s26, 5  ;;  %s427_s13 = sadd.s32 (!%p190_p10), %s745_s18, %s573_s12 }
  0x16   : > { %s215_s10 = scalar_lea.vmem (!%p190_p10), [#allocation2], %s560_s9 }
  0x18   : > { %v244_v0 = vld [vmem:[%s989_s1] sm:$0xff]  ;;  %vm273_vm0 = vcmask 31744   ;;  %v246_v1 = vld [vmem:[%s989_s1 + $0x10] sm:$0xff]  ;;  %s877_s14 = scalar_select %p227_p12, %s749_s19, 1  ;;  %v763_v3 = vmov 0   ;;  %v250_v5 = vld [vmem:[%s990_s2 + $0x8] sm:$0xff]  ;;  %v385_v12 = vlaneseq }
  0x19   : > { %584 = vmatprep.mubr.msk.f32.mxu0 %vm273_vm0, %v244_v0  ;;  %v249_v2 = vld [vmem:[%s990_s2] sm:$0xff]  ;;  %587 = vmatprep.mubr.msk.f32.mxu1 %vm273_vm0, %v246_v1  ;;  %v251_v4 = vld [vmem:[%s990_s2 + $0x10] sm:$0xff]  ;;  %s884_s27 = scalar_select %p229_p13, %s745_s18, 3  ;;  %v252_v6 = vld [vmem:[%s990_s2 + $0x18] sm:$0xff]  ;;  %vm286_vm1 = vcmask 1043456  }
  0x1a   : > { %667 = vset.pattern.permute.xlu0 %v763_v3  ;;  %668 = vset.pattern.permute.xlu1 %v763_v3  ;;  %s561_s30 = sshll.u32 %s877_s14, 2  ;;  %v245_v8 = vld [vmem:[%s989_s1 + $0x8] sm:$0xff]  ;;  %v247_v9 = vld [vmem:[%s989_s1 + $0x18] sm:$0xff]  ;;  %v386_v15 = vand.u32 127, %v385_v12  ;;  %s764_s18 = smov [#allocation2]  }
  0x1b   : > { %255 = vperm.xlu0 %667, %v249_v2   ;;  %265 = vperm.xlu1 %668, %v251_v4   ;;  %s232_s8 = sadd.s32 %s561_s30, %s884_s27  ;;  %s673_s19 = sshll.u32 %s764_s18, 4  ;;  %s674_s19 = int_to_ptr.vmem [resolvable:$false] %s673_s19 }
  0x1c   : > { %s562_s11 = sshll.u32 %s232_s8, 2  ;;  %s384_s8 = ssub.s32 400, %s571_s6 }
  0x1d   : > { %s234_s23 = scalar_lea.vmem %s988_s0, %s562_s11  ;;  %v387_v16 = vstv %s384_s8  ;;  %s430_s11 = sshll.u32 %s215_s10, 4  ;;  %s923_s11 = int_to_ptr.vmem [resolvable:$true] %s430_s11 }
  0x1e   : > { %v248_v7 = vld [vmem:[%s234_s23] sm:$0xf]  ;;  %vm909_vm2 = vcmp.lt.s32.totalorder %v386_v15, %v387_v16  ;;  %s574_s23 = sshll.u32 %s427_s13, 7  ;;  %s932_s6 = scalar_lea.sflag [#allocation3], %s213_s26 }
  0x1f   : > { %260 = vperm.xlu0 %667, %v250_v5   ;;  %270 = vperm.xlu1 %668, %v252_v6   ;;  %s928_s30 = scalar_lea.hbm %s991_s3, %s574_s23  ;;  %s669_s8 = scalar_lea.vmem %s923_s11, 512 }
  0x20   : > { %582 = vmatprep.subr.msk.mxu0 %vm286_vm1, %v248_v7  ;;  %590 = vmatprep.subr.msk.mxu1 %vm286_vm1, %v248_v7  ;;  %p670_p0 = scmp.ne.s32.totalorder %s923_s11, %s669_s8  ;;  %s675_s9 = scalar_lea.vmem %s674_s19, 1024 }
  0x21   : > { %583 = vmatpush3.msk.msra.mxu0 %vm286_vm1, %v248_v7  ;;  %591 = vmatpush3.msk.msra.mxu1 %vm286_vm1, %v248_v7  ;;  %p676_p4 = scmp.lt.s32.totalorder %s923_s11, %s674_s19  ;;  %p677_p5 = scmp.lt.s32.totalorder %s675_s9, %s669_s8 }
  0x22   : > { %585 = vmatmul.mubr.msk.f32.vlgmr.msra.gmra.mxu0 %vm273_vm0, %v245_v8  ;;  %588 = vmatmul.mubr.msk.f32.vlgmr.msra.gmra.mxu1 %vm273_vm0, %v247_v9  ;;  %p671_p1 = pnand %p670_p0, %p844_p3 }
  0x23   : > { %p678_p6 = por %p677_p5, %p676_p4 }
  0x24   : > { %p672_p2 = pneg %p671_p1 }
  0x26   : > { %p679_p7 = pnand %p678_p6, %p672_p2 }
  0x96   : > { %v256_v10 = vpop.permute.xlu0 %255  ;;  %v266_v11 = vpop.permute.xlu1 %265 }
  0x9a   : > { %v261_v13 = vpop.permute.xlu0 %260  ;;  %v271_v14 = vpop.permute.xlu1 %270 }
  0xe2   : > { %v586_v17 = vpop.f32.mrf.mxu0  ;;  %v589_v18 = vpop.f32.mrf.mxu1 }
  0xe3   : > { %v362_v19 = vadd.f32 %v586_v17, %v261_v13  ;;  %v372_v20 = vadd.f32 %v589_v18, %v271_v14 }
  0xe4   : > { %v356_v21 = vpop.f32.mrf.mxu0  ;;  %v366_v22 = vpop.f32.mrf.mxu1 }
  0xe5   : > { %v376_v24 = vmax.f32 %v362_v19, 0.0  ;;  %v357_v25 = vadd.f32 %v356_v21, %v256_v10  ;;  %v378_v26 = vmax.f32 %v372_v20, 0.0  ;;  %v367_v27 = vadd.f32 %v366_v22, %v266_v11 }
  0xe7   : > { %380 = vst [vmem:[%s215_s10 + $0x8] sm:$0xff] %v376_v24  ;;  %v375_v28 = vmax.f32 %v357_v25, 0.0  ;;  %382 = vst [vmem:[%s215_s10 + $0x18] sm:$0xff] %v378_v26  ;;  %v377_v29 = vmax.f32 %v367_v27, 0.0  ;;  %v390_v30 = vsel %vm909_vm2, %v376_v24, 0.0  ;;  %v392_v33 = vsel %vm909_vm2, %v378_v26, 0.0 }
  0xe8   : > { %395 = vadd.xlane.f32.xlu1 %v390_v30 }
  0xe9   : > { %379 = vst [vmem:[%s215_s10] sm:$0xff] %v375_v28  ;;  %381 = vst [vmem:[%s215_s10 + $0x10] sm:$0xff] %v377_v29  ;;  %v389_v31 = vsel %vm909_vm2, %v375_v28, 0.0  ;;  %v391_v32 = vsel %vm909_vm2, %v377_v29, 0.0 }
  0xea   : > { %393 = vadd.xlane.f32.xlu0 %v389_v31 }
  0xee   : > { %397 = vadd.xlane.f32.xlu0 %v391_v32 }
  0xf2   : > { %399 = vadd.xlane.f32.xlu0 %v392_v33 }
  0xf3   : > { %682 = shalt.err (!%p679_p7)
}
  0xf4   : > { %s683_s26 = scalar_lea.hbm %s928_s30, 512  ;;  %s687_s13 = scalar_lea.hbm %s991_s3, 4096 }
  0xf5   : > { %p684_p9 = scmp.ne.s32.totalorder %s928_s30, %s683_s26  ;;  %p688_p12 = scmp.lt.s32.totalorder %s928_s30, %s991_s3 }
  0xf6   : > { %p689_p13 = scmp.lt.s32.totalorder %s687_s13, %s683_s26 }
  0xf7   : > { %p685_p10 = pnand %p684_p9, %p844_p3 }
  0xf8   : > { %p690_p0 = por %p689_p13, %p688_p12 }
  0xf9   : > { %p686_p11 = pneg %p685_p10 }
  0xfb   : > { %p691_p1 = pnand %p690_p0, %p686_p11 }
  0xfd   : > { %694 = shalt.err (!%p691_p1)
}
  0xfe   : > { %s765_s5 = smov 128   ;;  %s766_s8 = smov 512   ;;  %vm401_vm3 = vcmask 7168  }
  0xff   : > { %s767_s18 = smov 8   ;;  %s563_s19 = sshll.u32 %s884_s27, 2 }
 0x100   : > { %592 = dma.vmem_to_hbm [thread:$0]  (%p844_p3), %s923_s11, 512, %s928_s30, %s932_s6, %s765_s5, %s766_s8, %s767_s18  }
 0x101   : > { %s564_s9 = sshll.u32 %s877_s14, 4 }
 0x102   : > { %s241_s10 = sadd.s32 %s564_s9, %s563_s19 }
 0x103   : > { %s565_s12 = sshll.u32 %s241_s10, 3 }
 0x104   : > { %s243_s13 = scalar_lea.vmem %s992_s4, %s565_s12 }
 0x171   : > { %v396_v34 = vpop.xlane.xlu1 %395 }
 0x172   : > { %403 = vst.msk [vmem:[%s243_s13 + $0x8] sm:$0xff] %vm401_vm3, %v396_v34 }
 0x173   : > { %v394_v35 = vpop.xlane.xlu0 %393 }
 0x174   : > { %402 = vst.msk [vmem:[%s243_s13] sm:$0xff] %vm401_vm3, %v394_v35 }
 0x177   : > { %v398_v36 = vpop.xlane.xlu0 %397 }
 0x178   : > { %404 = vst.msk [vmem:[%s243_s13 + $0x10] sm:$0xff] %vm401_vm3, %v398_v36 }
 0x17b   : > { %v400_v37 = vpop.xlane.xlu0 %399 }
 0x17c   : > { %405 = vst.msk [vmem:[%s243_s13 + $0x18] sm:$0xff] %vm401_vm3, %v400_v37 }
 0x17d PF: > { %p598_p3 = scmp.ge.s32.totalorder %s761_s22, 2  ;;  %s448_s28 = sand.u32 1, %s733_s15  }
 0x17e   : > { %s449_s14 = scalar_lea.sflag [#allocation3], %s448_s28 }
 0x17f   : > { %p595_p2 = pnand %p598_p3, %p853_p8 }
 0x181   : > { %p596_p4 = pneg %p595_p2 }
 0x183   : > { %728 = dma.done.wait (%p596_p4), %s449_s14, 512  }
 0x184   : > { %730 = vsyncadd (%p596_p4), %s449_s14, 4294966784  ;;  %s18_s22 = sadd.s32 1, %s761_s22   ;;  %s999_s27 = sld [smem:[#allocation5_spill]] }
 0x185   : > { %p15_p5 = scmp.ge.s32.totalorder %s18_s22, 10   ;;  %s1000_s15 = smov %s737_s16 }
 0x186   : > { %s1001_s16 = smov %s741_s17  ;;  %s1002_s17 = smov %s862_s7 }
 0x187   : > { %s1003_s18 = smov %s753_s20  ;;  %s1004_s19 = smov %s757_s21 }
 0x188   : > { %s1005_s20 = smov %s1008_s25  ;;  %17 = sbr.rel (!%p15_p5) target bundleno = 5 (0x5), region = 79 }
 0x18a   : > { %s1006_s21 = smov %s999_s27 }
 0x18d   :  { %466 = vsyncpa [#allocation3], 1 }
 0x18e   :  { %468 = vsyncpa [#allocation3 + $0x1], 1 }

</bundles_post_ra>
